<compile_context>
chip_gen: v5e
topology: v5e:2x2
jax: 0.10.0
libtpu: 0.0.40
codegen_flags: <defaults>
</compile_context>

<pallas_src>
import jax
import jax.numpy as jnp
from jax.experimental import pallas as pl
from jax.experimental.pallas import tpu as pltpu

INPUT_DIM, HIDDEN_DIM, OUTPUT_DIM = 124, 128, 50
LANE = 128


def _round_up(n, m):
    return ((n + m - 1) // m) * m


def mlp_kernel(x_ref, w1_ref, b1_ref, w2_ref, b2_ref, o_ref):
    # layer 1: (TB, Dp) @ (Dp, H) on the MXU, f32 accumulate, + bias, ReLU
    h = jnp.dot(x_ref[...], w1_ref[...], preferred_element_type=jnp.float32)
    h = jnp.maximum(h + b1_ref[...], 0.0)
    # layer 2: bf16 operands, f32 accumulate, lane-dense (TB, Op) output store
    h = h.astype(w2_ref.dtype)
    o_ref[...] = (jnp.dot(h, w2_ref[...], preferred_element_type=jnp.float32)
                  + b2_ref[...]).astype(o_ref.dtype)


def prepare_params(w1, b1, w2, b2, *, compute_dtype=jnp.bfloat16):
    """One-time parameter preprocessing (keep OUT of the per-call path).

    Inputs use the PyTorch nn.Linear layout:
      w1: (H, D_in), b1: (H,), w2: (O, H), b2: (O,)
    Returns pre-transposed, lane-padded bf16 weights and f32 biases.
    """
    H, D_in = w1.shape
    O = w2.shape[0]
    Dp = _round_up(D_in, LANE)   # 124 -> 128
    Op = _round_up(O, LANE)      # 50  -> 128

    w1_t = jnp.zeros((Dp, H), jnp.float32).at[:D_in, :].set(w1.T)
    w2_t = jnp.zeros((H, Op), jnp.float32).at[:, :O].set(w2.T)
    b1_p = b1.reshape(1, H).astype(jnp.float32)
    b2_p = jnp.zeros((1, Op), jnp.float32).at[0, :O].set(b2)

    return dict(
        w1=w1_t.astype(compute_dtype),
        b1=b1_p,
        w2=w2_t.astype(compute_dtype),
        b2=b2_p,
        dims=(D_in, H, O, Dp, Op),
    )


def mlp_forward(x, params, *, max_batch_tile=128):
    """x: (B, D_in) float32 -> (B, O) float32."""
    D_in, H, O, Dp, Op = params["dims"]
    B = x.shape[0]

    # batch tiling: sublane-aligned tile, "parallel" grid axis
    tb = min(max_batch_tile, _round_up(B, 8))
    Bp = _round_up(B, tb)

    xp = jnp.zeros((Bp, Dp), jnp.float32).at[:B, :D_in].set(x)
    xp = xp.astype(params["w1"].dtype)

    out = pl.pallas_call(
        mlp_kernel,
        out_shape=jax.ShapeDtypeStruct((Bp, Op), jnp.float32),
        grid=(Bp // tb,),
        in_specs=[
            pl.BlockSpec((tb, Dp), lambda i: (i, 0)),
            pl.BlockSpec((Dp, H), lambda i: (0, 0)),
            pl.BlockSpec((1, H), lambda i: (0, 0)),
            pl.BlockSpec((H, Op), lambda i: (0, 0)),
            pl.BlockSpec((1, Op), lambda i: (0, 0)),
        ],
        out_specs=pl.BlockSpec((tb, Op), lambda i: (i, 0)),
        compiler_params=pltpu.CompilerParams(
            dimension_semantics=("parallel",)),
    )(xp, params["w1"], params["b1"], params["w2"], params["b2"])

    return out[:B, :O]


def reference(x, w1, b1, w2, b2):
    h = jnp.maximum(jnp.dot(x, w1.T) + b1, 0.0)
    return jnp.dot(h, w2.T) + b2


if __name__ == "__main__":
    BATCH = 8

    key = jax.random.PRNGKey(0)
    kx, kw1, kb1, kw2, kb2 = jax.random.split(key, 5)

    x = jax.random.normal(kx, (BATCH, INPUT_DIM), dtype=jnp.float32)

    # deterministic synthetic parameters (nn.Linear init ranges / layouts)
    bound1 = 1.0 / (INPUT_DIM ** 0.5)
    w1 = jax.random.uniform(kw1, (HIDDEN_DIM, INPUT_DIM), jnp.float32, -bound1, bound1)
    b1 = jax.random.uniform(kb1, (HIDDEN_DIM,), jnp.float32, -bound1, bound1)
    bound2 = 1.0 / (HIDDEN_DIM ** 0.5)
    w2 = jax.random.uniform(kw2, (OUTPUT_DIM, HIDDEN_DIM), jnp.float32, -bound2, bound2)
    b2 = jax.random.uniform(kb2, (OUTPUT_DIM,), jnp.float32, -bound2, bound2)

    params = prepare_params(w1, b1, w2, b2)

    out = mlp_forward(x, params)
    out = jax.block_until_ready(out)

    ref = reference(x, w1, b1, w2, b2)
    assert out.shape == (BATCH, OUTPUT_DIM), out.shape
    # bf16 weights/activations with f32 accumulation -> relaxed tolerance
    max_err = float(jnp.max(jnp.abs(out - ref)))
    assert jnp.allclose(out, ref, atol=2e-2, rtol=2e-2), max_err

    print("KERNEL_OK")
</pallas_src>

<mosaic_0001>
module attributes {stable_mosaic.version = 11 : i64} {
  func.func @mlp_kernel(%arg0: i32, %arg1: memref<8x128xbf16, #tpu.memory_space<vmem>>, %arg2: memref<128x128xbf16, #tpu.memory_space<vmem>>, %arg3: memref<1x128xf32, #tpu.memory_space<vmem>>, %arg4: memref<128x128xbf16, #tpu.memory_space<vmem>>, %arg5: memref<1x128xf32, #tpu.memory_space<vmem>>, %arg6: memref<8x128xf32, #tpu.memory_space<vmem>>) attributes {dimension_semantics = [#tpu.dimension_semantics<parallel>], iteration_bounds = array<i64: 1>, scalar_prefetch = 0 : i64, scratch_operands = 0 : i64, tpu.core_type = #tpu.core_type<tc>, window_params = [{transform_indices = @transform_0, window_bounds = array<i64: 8, 128>}, {pipeline_mode = #tpu.pipeline_mode<synchronous>, transform_indices = @transform_1, window_bounds = array<i64: 128, 128>}, {pipeline_mode = #tpu.pipeline_mode<synchronous>, transform_indices = @transform_2, window_bounds = array<i64: 1, 128>}, {pipeline_mode = #tpu.pipeline_mode<synchronous>, transform_indices = @transform_3, window_bounds = array<i64: 128, 128>}, {pipeline_mode = #tpu.pipeline_mode<synchronous>, transform_indices = @transform_4, window_bounds = array<i64: 1, 128>}, {transform_indices = @transform_5, window_bounds = array<i64: 8, 128>}]} {
    %c0 = arith.constant 0 : index
    %c0_0 = arith.constant 0 : index
    %0 = vector.load %arg1[%c0, %c0_0] : memref<8x128xbf16, #tpu.memory_space<vmem>>, vector<8x128xbf16>
    %c0_1 = arith.constant 0 : index
    %c0_2 = arith.constant 0 : index
    %1 = vector.load %arg2[%c0_1, %c0_2] : memref<128x128xbf16, #tpu.memory_space<vmem>>, vector<128x128xbf16>
    %cst = arith.constant dense<0.000000e+00> : vector<8x128xf32>
    %2 = tpu.matmul %0, %1, %cst {dimension_numbers = #tpu.dot_dimension_numbers<[1], [0], [0], [1], [0, 0, 1, 1], [], []>} : vector<8x128xbf16>, vector<128x128xbf16>, vector<8x128xf32> -> vector<8x128xf32>
    %c0_3 = arith.constant 0 : index
    %c0_4 = arith.constant 0 : index
    %3 = vector.load %arg3[%c0_3, %c0_4] : memref<1x128xf32, #tpu.memory_space<vmem>>, vector<1x128xf32>
    %4 = vector.broadcast %3 : vector<1x128xf32> to vector<8x128xf32>
    %5 = arith.addf %2, %4 : vector<8x128xf32>
    %cst_5 = arith.constant 0.000000e+00 : f32
    %6 = vector.broadcast %cst_5 : f32 to vector<8x128xf32>
    %7 = arith.maximumf %5, %6 : vector<8x128xf32>
    %8 = arith.truncf %7 : vector<8x128xf32> to vector<8x128xbf16>
    %c0_6 = arith.constant 0 : index
    %c0_7 = arith.constant 0 : index
    %9 = vector.load %arg4[%c0_6, %c0_7] : memref<128x128xbf16, #tpu.memory_space<vmem>>, vector<128x128xbf16>
    %cst_8 = arith.constant dense<0.000000e+00> : vector<8x128xf32>
    %10 = tpu.matmul %8, %9, %cst_8 {dimension_numbers = #tpu.dot_dimension_numbers<[1], [0], [0], [1], [0, 0, 1, 1], [], []>} : vector<8x128xbf16>, vector<128x128xbf16>, vector<8x128xf32> -> vector<8x128xf32>
    %c0_9 = arith.constant 0 : index
    %c0_10 = arith.constant 0 : index
    %11 = vector.load %arg5[%c0_9, %c0_10] : memref<1x128xf32, #tpu.memory_space<vmem>>, vector<1x128xf32>
    %12 = vector.broadcast %11 : vector<1x128xf32> to vector<8x128xf32>
    %13 = arith.addf %10, %12 : vector<8x128xf32>
    %c0_11 = arith.constant 0 : index
    %c0_12 = arith.constant 0 : index
    %14 = vector.load %arg6[%c0_11, %c0_12] : memref<8x128xf32, #tpu.memory_space<vmem>>, vector<8x128xf32>
    tpu.vector_store %arg6[%c0_11, %c0_12], %13 {strides = array<i32>} : memref<8x128xf32, #tpu.memory_space<vmem>>, vector<8x128xf32>,
    return
  }
  func.func @transform_0(%arg0: i32) -> (i32, i32) {
    %c0_i32 = arith.constant 0 : i32
    %c0_i32_0 = arith.constant 0 : i32
    return %arg0, %c0_i32 : i32, i32
  }
  func.func @transform_1(%arg0: i32) -> (i32, i32) {
    %c0_i32 = arith.constant 0 : i32
    %c0_i32_0 = arith.constant 0 : i32
    %c0_i32_1 = arith.constant 0 : i32
    return %c0_i32, %c0_i32_0 : i32, i32
  }
  func.func @transform_2(%arg0: i32) -> (i32, i32) {
    %c0_i32 = arith.constant 0 : i32
    %c0_i32_0 = arith.constant 0 : i32
    %c0_i32_1 = arith.constant 0 : i32
    return %c0_i32, %c0_i32_0 : i32, i32
  }
  func.func @transform_3(%arg0: i32) -> (i32, i32) {
    %c0_i32 = arith.constant 0 : i32
    %c0_i32_0 = arith.constant 0 : i32
    %c0_i32_1 = arith.constant 0 : i32
    return %c0_i32, %c0_i32_0 : i32, i32
  }
  func.func @transform_4(%arg0: i32) -> (i32, i32) {
    %c0_i32 = arith.constant 0 : i32
    %c0_i32_0 = arith.constant 0 : i32
    %c0_i32_1 = arith.constant 0 : i32
    return %c0_i32, %c0_i32_0 : i32, i32
  }
  func.func @transform_5(%arg0: i32) -> (i32, i32) {
    %c0_i32 = arith.constant 0 : i32
    %c0_i32_0 = arith.constant 0 : i32
    return %arg0, %c0_i32 : i32, i32
  }
}

</mosaic_0001>

<bundles_post_ra>
// kernel: tpu_custom_call.1
= control target key start
LH: loop header
LB: loop body
LE: loop exit
PB: predicated region body
PF: predicated region fallthrough
CT: control target
= control target key end

     0   :  { %10 = vsyncpa [#allocation3], 0  ;;  %s494_s0 = inlined_call_operand.hbm [shape: bf16[8,128], index: 0, kind: input, shape index: {}]   ;;  %s495_s1 = inlined_call_operand.hbm [shape: bf16[128,128], index: 1, kind: input, shape index: {}]   ;;  %s496_s2 = inlined_call_operand.vmem [shape: f32[1,128], index: 2, kind: input, shape index: {}]   ;;  %s497_s3 = inlined_call_operand.hbm [shape: bf16[128,128], index: 3, kind: input, shape index: {}]   ;;  %s498_s4 = inlined_call_operand.vmem [shape: f32[1,128], index: 4, kind: input, shape index: {}]   ;;  %s499_s5 = inlined_call_operand.hbm [shape: f32[8,128], index: 5, kind: output, shape index: {}]  }
   0x1   :  { %11 = vsyncpa [#allocation6], 0  ;;  %s28_s20 = sshll.u32 %s495_s1, 4  ;;  %s29_s20 = int_to_ptr.hbm [resolvable:$true] %s28_s20 }
   0x2   :  { %12 = vsyncpa [#allocation4], 0  ;;  %s440_s21 = smov [#allocation5]   ;;  %s18_s25 = sshll.u32 %s494_s0, 4  ;;  %s19_s25 = int_to_ptr.hbm [resolvable:$true] %s18_s25 }
   0x3   :  { %s30_s22 = sshll.u32 %s440_s21, 4  ;;  %s441_s26 = smov 64   ;;  %s31_s22 = int_to_ptr.vmem [resolvable:$true] %s30_s22 }
   0x4   :  { %s442_s27 = smov 4   ;;  %s443_s28 = smov [#allocation2]  }
   0x5   :  { %36 = dma.hbm_to_vmem [thread:$0]  %s29_s20, 1024, %s31_s22, [#allocation6], %s441_s26, %s441_s26, %s442_s27  }
   0x6   :  { %s20_s29 = sshll.u32 %s443_s28, 4  ;;  %s43_s7 = sshll.u32 %s497_s3, 4  ;;  %s21_s29 = int_to_ptr.vmem [resolvable:$true] %s20_s29  ;;  %s44_s7 = int_to_ptr.hbm [resolvable:$true] %s43_s7 }
   0x7   :  { %23 = dma.hbm_to_vmem [thread:$0]  %s19_s25, 64, %s21_s29, [#allocation3]  }
   0x8   :  { %s444_s1 = smov [#allocation7]  }
   0x9   :  { %s45_s8 = sshll.u32 %s444_s1, 4  ;;  %s46_s8 = int_to_ptr.vmem [resolvable:$true] %s45_s8 }
   0xa   :  { %51 = dma.hbm_to_vmem [thread:$0]  %s44_s7, 1024, %s46_s8, [#allocation6], %s441_s26, %s441_s26, %s442_s27  }
   0xb   :  { %434 = dma.done.wait [#allocation3], 64  }
   0xc   :  { %435 = vsyncadd [#allocation3], 4294967232 }
   0xd   :  { %436 = dma.done.wait [#allocation6], 2048  }
   0xe   :  { %437 = vsyncadd [#allocation6], 4294965248  ;;  %v321_v0 = vld [vmem:[#allocation5 + $0x38] sm:$0xff]  ;;  %v320_v1 = vld [vmem:[#allocation5 + $0x30] sm:$0xff]  ;;  %s445_s11 = smov [#allocation8]   ;;  %s239_s15 = sshll.u32 %s499_s5, 4  ;;  %s240_s15 = int_to_ptr.hbm [resolvable:$true] %s239_s15 }
   0xf   :  { %135 = vmatpush.bf16.msra.mxu0 %v321_v0  ;;  %v329_v2 = vld [vmem:[#allocation7 + $0x38] sm:$0xff]  ;;  %v328_v3 = vld [vmem:[#allocation7 + $0x30] sm:$0xff]  ;;  %v319_v4 = vld [vmem:[#allocation5 + $0x28] sm:$0xff]  ;;  %s237_s12 = sshll.u32 %s445_s11, 4  ;;  %s238_s12 = int_to_ptr.vmem [resolvable:$true] %s237_s12 }
  0x10   :  { %218 = vmatpush.bf16.msra.mxu1 %v329_v2  ;;  %v327_v5 = vld [vmem:[#allocation7 + $0x28] sm:$0xff]  ;;  %v318_v6 = vld [vmem:[#allocation5 + $0x20] sm:$0xff]  ;;  %v317_v8 = vld [vmem:[#allocation5 + $0x18] sm:$0xff] }
  0x11   :  { %v326_v7 = vld [vmem:[#allocation7 + $0x20] sm:$0xff]  ;;  %v325_v9 = vld [vmem:[#allocation7 + $0x18] sm:$0xff]  ;;  %v316_v10 = vld [vmem:[#allocation5 + $0x10] sm:$0xff] }
  0x12   :  { %v324_v11 = vld [vmem:[#allocation7 + $0x10] sm:$0xff]  ;;  %v315_v12 = vld [vmem:[#allocation5 + $0x8] sm:$0xff]  ;;  %v314_v13 = vld [vmem:[#allocation5] sm:$0xff] }
  0x13   :  { %136 = vmatpush.bf16.msra.mxu0 %v320_v1  ;;  %v66_v14 = vld [vmem:[#allocation2] sm:$0xf]  ;;  %v323_v15 = vld [vmem:[#allocation7 + $0x8] sm:$0xff]  ;;  %v322_v16 = vld [vmem:[#allocation7] sm:$0xff] }
  0x14   :  { %219 = vmatpush.bf16.msra.mxu1 %v328_v3  ;;  %v336_v17 = vld [vmem:[%s496_s2] ss:$0 sm:$0xff] }
  0x15   :  { %v337_v23 = vld [vmem:[%s498_s4] ss:$0 sm:$0xff] }
  0x17   :  { %137 = vmatpush.bf16.msra.mxu0 %v319_v4 }
  0x18   :  { %220 = vmatpush.bf16.msra.mxu1 %v327_v5 }
  0x1b   :  { %138 = vmatpush.bf16.msra.mxu0 %v318_v6 }
  0x1c   :  { %221 = vmatpush.bf16.msra.mxu1 %v326_v7 }
  0x1f   :  { %139 = vmatpush.bf16.msra.mxu0 %v317_v8 }
  0x20   :  { %222 = vmatpush.bf16.msra.mxu1 %v325_v9 }
  0x23   :  { %140 = vmatpush.bf16.msra.mxu0 %v316_v10 }
  0x24   :  { %223 = vmatpush.bf16.msra.mxu1 %v324_v11 }
  0x27   :  { %141 = vmatpush.bf16.msra.mxu0 %v315_v12 }
  0x28   :  { %224 = vmatpush.bf16.msra.mxu1 %v323_v15 }
  0x2b   :  { %142 = vmatpush.bf16.msra.mxu0 %v314_v13 }
  0x2c   :  { %225 = vmatpush.bf16.msra.mxu1 %v322_v16 }
  0x2e   :  { %143 = vmatmul.bf16.vlgmr.msra.gmra.mxu0 %v66_v14 }
  0xab   :  { %v144_v18 = vpop.f32.mrf.mxu0 }
  0xac   :  { %v145_v19 = vadd.f32 %v336_v17, %v144_v18 }
  0xae   :  { %v148_v20 = vmax.f32 %v145_v19, 0.0 }
  0xb0   :  { %v149_v21 = vpack.c.bf16 %v148_v20, %v148_v20 }
  0xb2   :  { %226 = vmatmul.bf16.vlgmr.msra.gmra.mxu1 %v149_v21 }
  0xb3   :  { %v146_v22 = vpop.f32.mrf.mxu0 }
 0x12f   :  { %v227_v24 = vpop.f32.mrf.mxu1 }
 0x130   :  { %v228_v25 = vadd.f32 %v337_v23, %v227_v24 }
 0x132   :  { %231 = vst [vmem:[#allocation8] sm:$0xff] %v228_v25 }
 0x133   :  { %242 = dma.vmem_to_hbm [thread:$0]  %s238_s12, 128, %s240_s15, [#allocation4]  }
 0x137   :  { %v229_v26 = vpop.f32.mrf.mxu1 }
 0x138   :  { %438 = dma.done.wait [#allocation4], 128  }
 0x139   :  { %439 = vsyncadd [#allocation4], 4294967168 }
 0x13a   :  { %247 = vsyncpa [#allocation3], 1 }
 0x13b   :  { %248 = vsyncpa [#allocation6], 1 }
 0x13c   :  { %249 = vsyncpa [#allocation4], 1 }

</bundles_post_ra>
